<compile_context>
chip_gen: v6e
topology: v6e:2x2x1
jax: 0.10.0
libtpu: 0.0.40
codegen_flags: <defaults>
</compile_context>

<pallas_src>
import functools

import jax
import jax.numpy as jnp
from jax.experimental import pallas as pl
from jax.experimental.pallas import tpu as pltpu


# ----------------------------------------------------------------------------
# Kernels
# ----------------------------------------------------------------------------
def _linear_kernel(x_ref, w_ref, b_ref, o_ref, *, bf16_compute):
    # x_ref: (tile_m, K), w_ref: (K, tile_n), b_ref: (1, tile_n) f32,
    # o_ref: (tile_m, tile_n) in the input dtype.  Full K resident.
    x = x_ref[...]
    w = w_ref[...]
    if bf16_compute:
        # In-VMEM cast only; HBM traffic is unchanged.
        x = x.astype(jnp.bfloat16)
        w = w.astype(jnp.bfloat16)
    acc = jnp.dot(x, w, preferred_element_type=jnp.float32)
    o_ref[...] = (acc + b_ref[...]).astype(o_ref.dtype)


def _linear_kernel_ktiled(x_ref, w_ref, b_ref, o_ref, acc_ref, *, bf16_compute):
    # Large-K variant: f32 VMEM accumulator across the innermost ("arbitrary")
    # K grid axis, initialized / finalized via pl.when.
    @pl.when(pl.program_id(2) == 0)
    def _():
        acc_ref[...] = jnp.zeros_like(acc_ref)

    x = x_ref[...]
    w = w_ref[...]
    if bf16_compute:
        x = x.astype(jnp.bfloat16)
        w = w.astype(jnp.bfloat16)
    acc_ref[...] += jnp.dot(x, w, preferred_element_type=jnp.float32)

    @pl.when(pl.program_id(2) == pl.num_programs(2) - 1)
    def _():
        o_ref[...] = (acc_ref[...] + b_ref[...]).astype(o_ref.dtype)


# ----------------------------------------------------------------------------
# Generation-aware VMEM budget & tile selection
# ----------------------------------------------------------------------------
_TILE_M_CANDIDATES = (8192, 4096, 2048, 1024, 512, 256, 128, 64, 32, 16)


def _round_up(x, m):
    return (x + m - 1) // m * m


def _cdiv(a, b):
    return -(-a // b)


def _vmem_budget_bytes():
    """VMEM budget for tile sizing, keyed off the TPU generation."""
    try:
        kind = jax.devices()[0].device_kind.lower()
    except Exception:  # pragma: no cover - defensive
        kind = ""
    if "v2" in kind or "v3" in kind:
        return 8 << 20           # small-VMEM legacy chips
    if "v5" in kind or "v6" in kind:
        return 48 << 20          # 128 MiB physical VMEM on v5e / v6e
    return 24 << 20              # v7x (64 MiB physical) and unknown chips


def _pick_tiles(M, K, N, x_bytes, w_bytes, o_bytes, budget):
    """Return (tile_m, tile_n, tile_k) under `budget`, or None -> XLA fallback."""
    # N tiling: keep the whole weight resident (DMA'd once) whenever the
    # double-buffered (K, N) slab is cheap; otherwise tile lane-dense at 512.
    if N <= 512 or 2 * K * N * w_bytes <= (8 << 20):
        tile_n = N
    else:
        tile_n = 512

    # K tiling: only when the weight block alone would blow the budget.
    tile_k = K
    if 2 * K * tile_n * w_bytes > budget // 2:
        tk = (budget // 4) // max(2 * tile_n * w_bytes, 1)
        tk = max(128, (tk // 128) * 128)          # lane-aligned K chunks
        tile_k = min(tk, _round_up(K, 128))

    k_tiled = tile_k < K
    w_tile_bytes = 2 * tile_k * tile_n * w_bytes   # double-buffered W tile
    bias_bytes = 2 * tile_n * 4
    per_row = (2 * tile_k * x_bytes               # x tile (double-buffered)
               + 2 * tile_n * o_bytes             # out tile (double-buffered)
               + (tile_n * 4 if k_tiled else 0))  # f32 accumulator scratch

    m_cap = _round_up(max(M, 1), 16)
    tile_m = None
    for t in _TILE_M_CANDIDATES:
        if t > m_cap:
            continue
        if w_tile_bytes + bias_bytes + t * per_row <= budget:
            tile_m = t
            break
    if tile_m is None:
        return None  # even the smallest tile overflows VMEM

    # Never let the block exceed the array (full-dim blocks are always legal).
    tile_m = min(tile_m, M) if M >= 1 else tile_m

    # Keep >= 2 parallel grid steps so both v7x TensorCores get work; harmless
    # (one extra ~0.35us step) on single-TensorCore chips.
    if _cdiv(M, tile_m) * _cdiv(N, tile_n) == 1 and M > 16:
        tile_m = max(16, _round_up(_cdiv(M, 2), 16))

    return tile_m, tile_n, tile_k


# ----------------------------------------------------------------------------
# Pallas linear: y = x2d @ w + b
# ----------------------------------------------------------------------------
@functools.partial(
    jax.jit,
    static_argnames=("tile_m", "tile_n", "tile_k", "bf16_compute", "vmem_limit"))
def _pallas_linear(x2d, w, b2d, *, tile_m, tile_n, tile_k, bf16_compute,
                   vmem_limit):
    M, K = x2d.shape
    N = w.shape[1]
    out_dtype = x2d.dtype

    grid_m = pl.cdiv(M, tile_m)
    grid_n = pl.cdiv(N, tile_n)
    grid_k = pl.cdiv(K, tile_k)

    if grid_k == 1:
        # Common path: full K resident, no padding, output written directly.
        return pl.pallas_call(
            functools.partial(_linear_kernel, bf16_compute=bf16_compute),
            out_shape=jax.ShapeDtypeStruct((M, N), out_dtype),
            grid_spec=pltpu.PrefetchScalarGridSpec(
                num_scalar_prefetch=0,
                grid=(grid_m, grid_n),
                in_specs=[
                    pl.BlockSpec((tile_m, K), lambda i, j: (i, 0)),
                    pl.BlockSpec((K, tile_n), lambda i, j: (0, j)),
                    pl.BlockSpec((1, tile_n), lambda i, j: (0, j)),
                ],
                out_specs=pl.BlockSpec((tile_m, tile_n), lambda i, j: (i, j)),
            ),
            compiler_params=pltpu.CompilerParams(
                dimension_semantics=("parallel", "parallel"),
                vmem_limit_bytes=vmem_limit,
            ),
        )(x2d, w, b2d)

    # Rare large-K path: zero-pad K to a tile_k multiple so edge blocks never
    # feed garbage into the reduction (extra pad pass only on this path).
    k_pad = grid_k * tile_k
    if k_pad != K:
        x2d = jnp.pad(x2d, ((0, 0), (0, k_pad - K)))
        w = jnp.pad(w, ((0, k_pad - K), (0, 0)))

    return pl.pallas_call(
        functools.partial(_linear_kernel_ktiled, bf16_compute=bf16_compute),
        out_shape=jax.ShapeDtypeStruct((M, N), out_dtype),
        grid_spec=pltpu.PrefetchScalarGridSpec(
            num_scalar_prefetch=0,
            grid=(grid_m, grid_n, grid_k),
            in_specs=[
                pl.BlockSpec((tile_m, tile_k), lambda i, j, k: (i, k)),
                pl.BlockSpec((tile_k, tile_n), lambda i, j, k: (k, j)),
                pl.BlockSpec((1, tile_n), lambda i, j, k: (0, j)),
            ],
            out_specs=pl.BlockSpec((tile_m, tile_n), lambda i, j, k: (i, j)),
            scratch_shapes=[pltpu.VMEM((tile_m, tile_n), jnp.float32)],
        ),
        compiler_params=pltpu.CompilerParams(
            dimension_semantics=("parallel", "parallel", "arbitrary"),
            vmem_limit_bytes=vmem_limit,
        ),
    )(x2d, w, b2d)


def pallas_linear(x2d, w, b, *, bf16_compute=False):
    """y = x2d @ w + b via the Pallas TPU kernel (tiling picked per-generation)."""
    M, K = x2d.shape
    N = w.shape[1]
    budget = _vmem_budget_bytes()
    tiles = _pick_tiles(
        M, K, N,
        jnp.dtype(x2d.dtype).itemsize,
        jnp.dtype(w.dtype).itemsize,
        jnp.dtype(x2d.dtype).itemsize,
        budget)
    if tiles is None:
        # Shapes too large for any VMEM tiling under the budget: plain XLA dot.
        return (x2d @ w + b).astype(x2d.dtype)
    tile_m, tile_n, tile_k = tiles
    b2d = b.reshape(1, N).astype(jnp.float32)
    vmem_limit = int(min(budget + (8 << 20), 128 << 20))
    return _pallas_linear(
        x2d, w, b2d,
        tile_m=int(tile_m), tile_n=int(tile_n), tile_k=int(tile_k),
        bf16_compute=bool(bf16_compute), vmem_limit=vmem_limit)


# ----------------------------------------------------------------------------
# TimeDistributed wrapper semantics
# ----------------------------------------------------------------------------
_MIN_MACS_FOR_PALLAS = 1 << 20  # below this, custom-call overhead dominates


def time_distributed_linear(x, w, b, batch_first=False, use_pallas=None,
                            bf16_compute=False):
    """JAX/Pallas equivalent of TimeDistributed_wrapper(nn.Linear(K, N)).

    x rank<=2 -> module applied directly.
    x rank>=3 -> flatten leading dims, apply linear, reshape back:
        batch_first=False: y.view(-1, x.shape[1], N)
        batch_first=True : y.view(x.shape[0], -1, N)
    use_pallas: None = auto (XLA fallback for tiny problems), True/False force.
    bf16_compute: opt-in bf16 MXU operands (f32 accumulation); default keeps
        f32 operands to match the PyTorch nn.Linear numerics.
    """
    # TODO(synk): the PyTorch wrapper is module-generic; only the canonical
    # nn.Linear inner module is implemented as a Pallas kernel here.
    F_in = x.shape[-1]
    N = w.shape[1]
    x_flat = x if x.ndim <= 2 else x.reshape(-1, F_in)
    M = x_flat.shape[0]

    if use_pallas is None:
        use_pallas = (M * F_in * N) >= _MIN_MACS_FOR_PALLAS

    if use_pallas:
        y = pallas_linear(x_flat, w, b, bf16_compute=bf16_compute)
    else:
        y = x_flat @ w + b  # tiny-problem fallback: fused XLA dot

    if x.ndim <= 2:
        return y
    if batch_first:
        return y.reshape(x.shape[0], -1, N)
    return y.reshape(-1, x.shape[1], N)


# ----------------------------------------------------------------------------
# Demo / correctness check
# ----------------------------------------------------------------------------
if __name__ == "__main__":
    # Small shapes consistent with TimeDistributed over a Linear module.
    T, B, F_in, F_out = 8, 4, 32, 32  # T*B = 32 rows

    key = jax.random.PRNGKey(0)
    kx, kw, kb = jax.random.split(key, 3)
    x = jax.random.normal(kx, (T, B, F_in), dtype=jnp.float32)
    w = jax.random.normal(kw, (F_in, F_out), dtype=jnp.float32) * 0.1
    b = jax.random.normal(kb, (F_out,), dtype=jnp.float32) * 0.1

    y_ref = (x.reshape(-1, F_in) @ w + b).reshape(-1, B, F_out)

    # Force the Pallas path so the kernel is exercised even at demo sizes.
    y = time_distributed_linear(x, w, b, batch_first=False, use_pallas=True)
    y = jax.block_until_ready(y)
    assert y.shape == (T, B, F_out), y.shape
    assert jnp.allclose(y, y_ref, atol=1e-2, rtol=1e-2), float(
        jnp.max(jnp.abs(y - y_ref)))

    # batch_first=True reshape path.
    y_bf = jax.block_until_ready(
        time_distributed_linear(x, w, b, batch_first=True, use_pallas=True))
    assert y_bf.shape == (T, B, F_out), y_bf.shape
    assert jnp.allclose(y_bf, y_ref.reshape(T, -1, F_out), atol=1e-2, rtol=1e-2)

    # Rank-2 path (wrapper passes straight through to the module).
    x2 = jax.random.normal(kx, (T, F_in), dtype=jnp.float32)
    y2 = jax.block_until_ready(
        time_distributed_linear(x2, w, b, use_pallas=True))
    assert y2.shape == (T, F_out)
    assert jnp.allclose(y2, x2 @ w + b, atol=1e-2, rtol=1e-2)

    # Opt-in bf16 compute (looser tolerance, f32 accumulation).
    y_b16 = jax.block_until_ready(
        time_distributed_linear(x, w, b, use_pallas=True, bf16_compute=True))
    assert jnp.allclose(y_b16, y_ref, atol=3e-2, rtol=3e-2)

    # Auto mode: tiny problem takes the XLA fallback (still correct).
    y_auto = jax.block_until_ready(time_distributed_linear(x, w, b))
    assert jnp.allclose(y_auto, y_ref, atol=1e-5, rtol=1e-5)

    print("KERNEL_OK")
</pallas_src>

<mosaic_0001>
module attributes {stable_mosaic.version = 11 : i64} {
  func.func @_linear_kernel(%arg0: i32, %arg1: i32, %arg2: memref<16x32xf32, #tpu.memory_space<vmem>>, %arg3: memref<32x32xf32, #tpu.memory_space<vmem>>, %arg4: memref<1x32xf32, #tpu.memory_space<vmem>>, %arg5: memref<16x32xf32, #tpu.memory_space<vmem>>) attributes {dimension_semantics = [#tpu.dimension_semantics<parallel>, #tpu.dimension_semantics<parallel>], iteration_bounds = array<i64: 2, 1>, scalar_prefetch = 0 : i64, scratch_operands = 0 : i64, tpu.core_type = #tpu.core_type<tc>, window_params = [{transform_indices = @transform_0, window_bounds = array<i64: 16, 32>}, {transform_indices = @transform_1, window_bounds = array<i64: 32, 32>}, {transform_indices = @transform_2, window_bounds = array<i64: 1, 32>}, {transform_indices = @transform_3, window_bounds = array<i64: 16, 32>}]} {
    %c0 = arith.constant 0 : index
    %c0_0 = arith.constant 0 : index
    %0 = vector.load %arg2[%c0, %c0_0] : memref<16x32xf32, #tpu.memory_space<vmem>>, vector<16x32xf32>
    %c0_1 = arith.constant 0 : index
    %c0_2 = arith.constant 0 : index
    %1 = vector.load %arg3[%c0_1, %c0_2] : memref<32x32xf32, #tpu.memory_space<vmem>>, vector<32x32xf32>
    %cst = arith.constant dense<0.000000e+00> : vector<16x32xf32>
    %2 = tpu.matmul %0, %1, %cst {dimension_numbers = #tpu.dot_dimension_numbers<[1], [0], [0], [1], [0, 0, 1, 1], [], []>} : vector<16x32xf32>, vector<32x32xf32>, vector<16x32xf32> -> vector<16x32xf32>
    %c0_3 = arith.constant 0 : index
    %c0_4 = arith.constant 0 : index
    %3 = vector.load %arg4[%c0_3, %c0_4] : memref<1x32xf32, #tpu.memory_space<vmem>>, vector<1x32xf32>
    %4 = vector.broadcast %3 : vector<1x32xf32> to vector<16x32xf32>
    %5 = arith.addf %2, %4 : vector<16x32xf32>
    %c0_5 = arith.constant 0 : index
    %c0_6 = arith.constant 0 : index
    %6 = vector.load %arg5[%c0_5, %c0_6] : memref<16x32xf32, #tpu.memory_space<vmem>>, vector<16x32xf32>
    tpu.vector_store %arg5[%c0_5, %c0_6], %5 {strides = array<i32>} : memref<16x32xf32, #tpu.memory_space<vmem>>, vector<16x32xf32>,
    return
  }
  func.func @transform_0(%arg0: i32, %arg1: i32) -> (i32, i32) {
    %c0_i32 = arith.constant 0 : i32
    %c0_i32_0 = arith.constant 0 : i32
    return %arg0, %c0_i32 : i32, i32
  }
  func.func @transform_1(%arg0: i32, %arg1: i32) -> (i32, i32) {
    %c0_i32 = arith.constant 0 : i32
    %c0_i32_0 = arith.constant 0 : i32
    return %c0_i32, %arg1 : i32, i32
  }
  func.func @transform_2(%arg0: i32, %arg1: i32) -> (i32, i32) {
    %c0_i32 = arith.constant 0 : i32
    %c0_i32_0 = arith.constant 0 : i32
    return %c0_i32, %arg1 : i32, i32
  }
  func.func @transform_3(%arg0: i32, %arg1: i32) -> (i32, i32) {
    %c0_i32 = arith.constant 0 : i32
    return %arg0, %arg1 : i32, i32
  }
}

</mosaic_0001>

<bundles_post_ra>
// kernel: _pallas_linear.1
= control target key start
LH: loop header
LB: loop body
LE: loop exit
PB: predicated region body
PF: predicated region fallthrough
CT: control target
= control target key end

     0   :  { %8 = vsyncpa [#allocation3], 0  ;;  %s938_s0 = inlined_call_operand.hbm [shape: f32[32,32], index: 0, kind: input, shape index: {}]   ;;  %s939_s1 = inlined_call_operand.hbm [shape: f32[32,32], index: 1, kind: input, shape index: {}]   ;;  %s940_s2 = inlined_call_operand.vmem [shape: f32[1,32], index: 2, kind: input, shape index: {}]   ;;  %s941_s3 = inlined_call_operand.hbm [shape: f32[32,32], index: 3, kind: output, shape index: {}]  }
   0x1   :  { %10 = vsyncpa [#allocation3 + $0x1], 0 }
   0x2   :  { %11 = vsyncpa [#allocation6], 0 }
   0x3   :  { %12 = vsyncpa [#allocation4], 0 }
   0x4   :  { %14 = vsyncpa [#allocation4 + $0x1], 0  ;;  %s744_s12 = smov 0   ;;  %s746_s13 = smov 0  }
   0x5   :  { %s748_s14 = smov 0   ;;  %s750_s15 = smov 0  }
   0x6   :  { %s752_s16 = smov 0   ;;  %s754_s17 = smov 0  }
   0x7 LB: > { %s460_s18 = sadd.s32 4294967295, %s715_s17   ;;  %s461_s19 = sadd.s32 4294967294, %s715_s17   ;;  %s715_s17 = sphi %s754_s17, %s20_s17   ;;  %s711_s16 = sphi %s752_s16, %s963_s16   ;;  %s707_s15 = sphi %s750_s15, %s962_s15   ;;  %s703_s14 = sphi %s748_s14, %s961_s14   ;;  %s699_s13 = sphi %s746_s13, %s960_s13   ;;  %s695_s12 = sphi %s744_s12, %s959_s12  }
   0x8   : > { %p52_p0 = scmp.ne.s32.totalorder %s699_s13, %s695_s12  ;;  %p778_p1 = scmp.eq.s32.totalorder %s460_s18, 0 }
   0x9   : > { %p782_p2 = scmp.eq.s32.totalorder %s460_s18, 1  ;;  %p136_p3 = scmp.eq.s32.totalorder %s461_s19, 1 }
   0xa   : > { %p788_p4 = por %p778_p1, %p52_p0  ;;  %p462_p5 = scmp.ge.s32.totalorder %s715_s17, 1 }
   0xb   : > { %p793_p6 = por %p136_p3, %p52_p0  ;;  %p143_p7 = scmp.lt.s32.totalorder %s715_s17, 3 }
   0xc   : > { %s947_s22 = scalar_select %p788_p4, 1, 0 }
   0xd   : > { %s948_s23 = scalar_select %p793_p6, 1, 0 }
   0xe   : > { %p798_p8 = pnand %p462_p5, %p143_p7  ;;  %s717_s25 = smov [#allocation5]  }
   0xf   : > { %s157_s26 = sshll.u32 %s717_s25, 4  ;;  %s32_s28 = sadd.s32 1, %s711_s16  ;;  %s158_s26 = int_to_ptr.vmem [resolvable:$true] %s157_s26 }
  0x10   : > { %p508_p9 = pneg %p798_p8  ;;  %s588_s29 = scalar_lea.vmem %s158_s26, 512 }
  0x11   : > { %p589_p13 = scmp.ne.s32.totalorder %s158_s26, %s588_s29  ;;  %p596_p5 = scmp.lt.s32.totalorder %s158_s26, %s158_s26 }
  0x12   : > { %p807_p11 = pnand %p508_p9, %p778_p1  ;;  %p597_p7 = scmp.lt.s32.totalorder %s588_s29, %s588_s29 }
  0x14   : > { %p579_p12 = pneg %p807_p11  ;;  %p598_p6 = por %p597_p7, %p596_p5 }
  0x16   : > { %p591_p0 = pnand %p589_p13, %p579_p12 }
  0x18   : > { %p592_p3 = pneg %p591_p0 }
  0x1a   : > { %p599_p4 = pnand %p598_p6, %p592_p3 }
  0x1c   : > { %602 = shalt.err (!%p599_p4)
}
  0x1d   : > { %s943_s30 = smov 128   ;;  %s944_s4 = smov 8  }
  0x1e   : > { %511 = dma.hbm_to_vmem [thread:$0]  (!%p807_p11), %s939_s1, 512, %s158_s26, [#allocation6], %s943_s30, %s943_s30, %s944_s4  }
  0x1f   : > { %p34_p4 = scmp.ge.s32.totalorder %s32_s28, 2  ;;  %s39_s7 = sadd.s32 1, %s703_s14 }
  0x20   : > { %p46_p6 = scmp.ne.s32.totalorder %s703_s14, %s699_s13  ;;  %p47_p9 = scmp.eq.s32.totalorder %s715_s17, 0 }
  0x21   : > { %s965_s28 = smov (%p34_p4, %s32_s28), 0  ;;  %p521_p0 = scmp.lt.s32.totalorder %s715_s17, 2 }
  0x22   : > { %p828_p12 = por %p47_p9, %p46_p6  ;;  %p834_p13 = por %p782_p2, %p46_p6 }
  0x23   : > { %s36_s10 = ssub.s32 %s711_s16, %s965_s28  ;;  %s177_s11 = sand.u32 1, %s703_s14  }
  0x24   : > { %p37_p11 = scmp.eq.s32.totalorder %s36_s10, 0  ;;  %s466_s18 = sshll.u32 %s177_s11, 4 }
  0x25   : > { %s481_s25 = sshll.u32 %s711_s16, 8  ;;  %s181_s5 = scalar_lea.vmem [#allocation2], %s466_s18 }
  0x26   : > { %s843_s19 = scalar_select %p37_p11, %s703_s14, %s39_s7  }
  0x27   : > { %s187_s29 = scalar_lea.hbm %s938_s0, %s481_s25  ;;  %s188_s6 = sshll.u32 %s181_s5, 4  ;;  %s189_s6 = int_to_ptr.vmem [resolvable:$true] %s188_s6 }
  0x28   : > { %p851_p2 = pnand %p521_p0, %p828_p12  ;;  %s178_s30 = scalar_lea.sflag [#allocation3], %s177_s11 }
  0x29   : > { %s616_s10 = scalar_lea.vmem %s189_s6, 256  ;;  %s720_s7 = smov [#allocation2]  }
  0x2a   : > { %p605_p3 = pneg %p851_p2  ;;  %p617_p5 = scmp.ne.s32.totalorder %s189_s6, %s616_s10 }
  0x2b   : > { %s621_s4 = sshll.u32 %s720_s7, 4  ;;  %s622_s4 = int_to_ptr.vmem [resolvable:$false] %s621_s4 }
  0x2c   : > { %p619_p7 = pnand %p617_p5, %p605_p3  ;;  %s623_s25 = scalar_lea.vmem %s622_s4, 512 }
  0x2d   : > { %p624_p6 = scmp.lt.s32.totalorder %s189_s6, %s622_s4  ;;  %p625_p9 = scmp.lt.s32.totalorder %s623_s25, %s616_s10 }
  0x2e   : > { %p620_p4 = pneg %p619_p7 }
  0x2f   : > { %p626_p11 = por %p625_p9, %p624_p6 }
  0x31   : > { %p627_p10 = pnand %p626_p11, %p620_p4 }
  0x33   : > { %630 = shalt.err (!%p627_p10)
}
  0x34   : > { %s954_s8 = smov 8   ;;  %s955_s18 = smov 128  }
  0x35   : > { %515 = dma.hbm_to_vmem [thread:$0]  (!%p851_p2), %s187_s29, 256, %s189_s6, %s178_s30, %s955_s18, %s955_s18, %s954_s8  }
  0x36   : > { %200 = sbr.rel (%p798_p8) target bundleno = 282 (0x11a), region = 32  ;;  %s865_s11 = sand.u32 (!%p798_p8), 1, %s699_s13  }
  0x37   : > { %s470_s4 = sshll.u32 (!%p798_p8), %s865_s11, 4  ;;  %s203_s26 = scalar_lea.sflag (!%p798_p8), [#allocation3], %s865_s11 }
  0x38   : > { %s206_s27 = scalar_lea.vmem (!%p798_p8), [#allocation2], %s470_s4  ;;  %p956_p12 = scmp.ne.s32.totalorder (!%p798_p8), %s947_s22, 0 }
  0x3b   : > { %682 = dma.done.wait (%p956_p12), %s203_s26, 256  }
  0x3c   : > { %684 = vsyncadd (%p956_p12), %s203_s26, 4294967040 }
  0x3d   : > { %686 = dma.done.wait (%p778_p1), [#allocation6], 512  }
  0x3e   : > { %688 = vsyncadd (%p778_p1), [#allocation6], 4294966784  ;;  %vm254_vm0 = vcmask 261120   ;;  %v246_v0 = vld [vmem:[#allocation5 + $0x18] sm:$0xff]  ;;  %v245_v1 = vld [vmem:[#allocation5 + $0x10] sm:$0xff]  ;;  %s235_s24 = scalar_lea.vmem [#allocation7], %s470_s4 }
  0x3f   : > { %489 = vmatprep.subr.mxu0 %v246_v0  ;;  %v241_v2 = vld [vmem:[%s206_s27] sm:$0xff]  ;;  %v244_v3 = vld [vmem:[#allocation5 + $0x8] sm:$0xff]  ;;  %s353_s30 = sshll.u32 %s235_s24, 4  ;;  %s482_s29 = sshll.u32 %s707_s15, 8  ;;  %s883_s30 = int_to_ptr.vmem [resolvable:$true] %s353_s30 }
  0x40   : > { %490 = vmatpush3.msra.mxu0 %v246_v0  ;;  %497 = vmatprep.mubr.msk.f32.mxu0 %vm254_vm0, %v241_v2  ;;  %v243_v4 = vld [vmem:[#allocation5] sm:$0xff]  ;;  %v242_v5 = vld [vmem:[%s206_s27 + $0x8] sm:$0xff]  ;;  %s888_s21 = scalar_lea.hbm %s941_s3, %s482_s29  ;;  %s339_s10 = scalar_lea.sflag [#allocation4], %s865_s11 }
  0x41   : > { %491 = vmatprep.subr.mxu0 %v245_v1  ;;  %v473_v6 = vld [vmem:[%s940_s2] ss:$0 sm:$0xff]  ;;  %s631_s15 = scalar_lea.vmem %s883_s30, 256  ;;  %s721_s7 = smov [#allocation7]  }
  0x42   : > { %492 = vmatpush3.msra.mxu0 %v245_v1  ;;  %p632_p1 = scmp.ne.s32.totalorder %s883_s30, %s631_s15  ;;  %s635_s25 = sshll.u32 %s721_s7, 4  ;;  %s636_s25 = int_to_ptr.vmem [resolvable:$false] %s635_s25 }
  0x43   : > { %493 = vmatprep.subr.mxu0 %v244_v3  ;;  %s637_s8 = scalar_lea.vmem %s636_s25, 512  ;;  %p638_p0 = scmp.lt.s32.totalorder %s883_s30, %s636_s25 }
  0x44   : > { %494 = vmatpush3.msra.mxu0 %v244_v3  ;;  %p633_p8 = pnand %p632_p1, %p834_p13  ;;  %p639_p2 = scmp.lt.s32.totalorder %s637_s8, %s631_s15 }
  0x45   : > { %495 = vmatprep.subr.mxu0 %v243_v4 }
  0x46   : > { %496 = vmatpush3.msra.mxu0 %v243_v4  ;;  %p634_p10 = pneg %p633_p8  ;;  %p640_p3 = por %p639_p2, %p638_p0 }
  0x47   : > { %498 = vmatmul.mubr.msk.f32.vlgmr.msra.gmra.mxu0 %vm254_vm0, %v242_v5 }
  0x48   : > { %p641_p5 = pnand %p640_p3, %p634_p10 }
 0x107   : > { %v499_v7 = vpop.f32.mrf.mxu0 }
 0x108   : > { %v333_v8 = vadd.f32 %v499_v7, %v473_v6 }
 0x109   : > { %v327_v9 = vpop.f32.mrf.mxu0 }
 0x10a   : > { %337 = vst.msk [vmem:[%s235_s24 + $0x8] sm:$0xff] %vm254_vm0, %v333_v8  ;;  %v328_v10 = vadd.f32 %v473_v6, %v327_v9 }
 0x10c   : > { %336 = vst.msk [vmem:[%s235_s24] sm:$0xff] %vm254_vm0, %v328_v10 }
 0x10d   : > { %644 = shalt.err (!%p641_p5)
}
 0x10e   : > { %s645_s18 = scalar_lea.hbm %s888_s21, 256  ;;  %s649_s27 = scalar_lea.hbm %s941_s3, 512 }
 0x10f   : > { %p646_p7 = scmp.ne.s32.totalorder %s888_s21, %s645_s18  ;;  %p650_p9 = scmp.lt.s32.totalorder %s888_s21, %s941_s3 }
 0x110   : > { %p651_p11 = scmp.lt.s32.totalorder %s649_s27, %s645_s18 }
 0x111   : > { %p647_p4 = pnand %p646_p7, %p834_p13 }
 0x112   : > { %p652_p12 = por %p651_p11, %p650_p9 }
 0x113   : > { %p648_p6 = pneg %p647_p4 }
 0x115   : > { %p653_p1 = pnand %p652_p12, %p648_p6 }
 0x117   : > { %656 = shalt.err (!%p653_p1)
}
 0x118   : > { %s722_s24 = smov 128   ;;  %s723_s29 = smov 8  }
 0x119   : > { %506 = dma.vmem_to_hbm [thread:$0]  (%p834_p13), %s883_s30, 256, %s888_s21, %s339_s10, %s722_s24, %s722_s24, %s723_s29  }
 0x11a PF: > { %s368_s5 = sand.u32 1, %s695_s12   ;;  %p957_p8 = scmp.ne.s32.totalorder %s948_s23, 0 }
 0x11b   : > { %p958_p10 = scmp.ge.s32.totalorder %s715_s17, 2  ;;  %s369_s6 = scalar_lea.sflag [#allocation4], %s368_s5 }
 0x11d   : > { %p517_p0 = pnand %p958_p10, %p957_p8 }
 0x11f   : > { %p518_p2 = pneg %p517_p0 }
 0x121   : > { %690 = dma.done.wait (%p518_p2), %s369_s6, 256  }
 0x122   : > { %692 = vsyncadd (%p518_p2), %s369_s6, 4294967040  ;;  %s20_s17 = sadd.s32 1, %s715_s17   ;;  %s959_s12 = smov %s699_s13 }
 0x123   : > { %p17_p3 = scmp.ge.s32.totalorder %s20_s17, 4   ;;  %s960_s13 = smov %s703_s14 }
 0x124   : > { %s961_s14 = smov %s843_s19  ;;  %s962_s15 = smov %s711_s16 }
 0x125   : > { %s963_s16 = smov %s965_s28  ;;  %19 = sbr.rel (!%p17_p3) target bundleno = 7 (0x7), region = 85 }
 0x12a   :  { %374 = vsyncpa [#allocation3], 1 }
 0x12b   :  { %376 = vsyncpa [#allocation3 + $0x1], 1 }
 0x12c   :  { %377 = vsyncpa [#allocation6], 1 }
 0x12d   :  { %378 = vsyncpa [#allocation4], 1 }
 0x12e   :  { %380 = vsyncpa [#allocation4 + $0x1], 1 }

</bundles_post_ra>
